<compile_context>
chip_gen: v7x
topology: tpu7x:2x2x1
jax: 0.10.0
libtpu: 0.0.40
codegen_flags: <defaults>
</compile_context>

<pallas_src>
import jax
import jax.numpy as jnp
from jax.experimental import pallas as pl
from jax.experimental.pallas import tpu as pltpu

_SUBLANE = 8


def _round_up(n, m):
    return ((n + m - 1) // m) * m


def _make_mlp_kernel(num_linear, mxu_dtype):
    """Fused MLP kernel for `num_linear` Linear layers.

    Kernel ref order: x, W1, b1, W2, b2, ..., Wn, bn, out.
    Tanh follows every Linear except the last (matches `layers[:-1]`).
    The layer loop is a fully-unrolled Python loop (tiny, static n) so the
    LLO scheduler sees straight-line code.
    """

    def kernel(x_ref, *refs):
        out_ref = refs[-1]
        param_refs = refs[:-1]
        h = x_ref[...]
        for i in range(num_linear):
            w = param_refs[2 * i][...]
            b = param_refs[2 * i + 1][...]  # (1, out), f32
            h = jnp.dot(h.astype(mxu_dtype), w.astype(mxu_dtype),
                        preferred_element_type=jnp.float32)
            h = h + b.astype(jnp.float32)   # VPU add + EUP tanh stay in f32
            if i < num_linear - 1:
                h = jnp.tanh(h)
        out_ref[...] = h.astype(out_ref.dtype)

    return kernel


def policy_net_forward(x, weights, biases, logsigma=None, *, discrete=True,
                       block_batch=4096, mxu_dtype=jnp.float32,
                       vmem_limit_bytes=32 * 1024 * 1024):
    """Run the PolicyNet forward pass via a single fused Pallas kernel.

    Args:
      x: (batch, ob_dim) float32 observations.
      weights: list of (in_dim, out_dim) weight matrices (transposed relative
        to PyTorch's (out, in) convention).
      biases: list of (out_dim,) bias vectors.
      logsigma: (ac_dim,) parameter, only returned when discrete=False.
      discrete: whether the policy is discrete.
      block_batch: target batch-tile size (rounded to a sublane multiple).
        Default 4096: with all feature widths padded to 128 lanes in VMEM,
        double-buffered x/out tiles + intermediates stay well under the
        32 MiB limit below on every generation (v5e/v6e/v7x); raise it
        together with vmem_limit_bytes for very large rollouts on
        v6e (128 MiB physical VMEM).
      mxu_dtype: dtype fed to the MXU (jnp.float32 or jnp.bfloat16).
        bf16 also halves the streaming-input DMA bytes; accumulation is
        always f32.
      vmem_limit_bytes: explicit scoped-VMEM limit (raises v5e's 16 MiB
        default; keeps headroom within v7x's 64 MiB physical VMEM).

    Returns:
      logits (batch, ac_dim) if discrete, else (means, logsigma).
    """
    num_linear = len(weights)
    batch, ob_dim = x.shape
    ac_dim = weights[-1].shape[1]

    # --- Batch tiling: sublane-aligned tile; NO wrapper-side padding of x.
    # Ragged last tile is handled by Pallas (OOB output rows are dropped).
    # Cap at ceil(batch/2) so the parallel axis has >=2 steps for v7x
    # megacore whenever the batch is big enough to split.
    tb = _round_up(block_batch, _SUBLANE)
    if batch >= 2 * _SUBLANE:
        tb = min(tb, _round_up(pl.cdiv(batch, 2), _SUBLANE))
    else:
        tb = min(tb, _round_up(batch, _SUBLANE))

    # bf16 streaming: halve the dominant x DMA read when the MXU runs bf16.
    x_stream = x.astype(mxu_dtype) if mxu_dtype != jnp.float32 else x

    # Interleave params as W1, b1, W2, b2, ...; biases as (1, out) 2-D tiles.
    flat_params = []
    for w, b in zip(weights, biases):
        flat_params.append(w.astype(mxu_dtype))
        flat_params.append(b.reshape(1, -1).astype(jnp.float32))

    kernel = _make_mlp_kernel(num_linear, mxu_dtype)

    grid = (pl.cdiv(batch, tb),)
    x_spec = pl.BlockSpec((tb, ob_dim), lambda i: (i, 0))
    # Constant index maps -> parameters stay resident across batch tiles.
    param_specs = [pl.BlockSpec(p.shape, lambda i: (0, 0))
                   for p in flat_params]
    # Output block last dim = ac_dim exactly (full-dim block, lane-narrow is
    # fine: masked vst cost << the 16x HBM writeback saved vs lane-padding).
    out_spec = pl.BlockSpec((tb, ac_dim), lambda i: (i, 0))

    y = pl.pallas_call(
        kernel,
        out_shape=jax.ShapeDtypeStruct((batch, ac_dim), jnp.float32),
        grid=grid,
        in_specs=[x_spec] + param_specs,
        out_specs=out_spec,
        compiler_params=pltpu.CompilerParams(
            dimension_semantics=("parallel",),
            vmem_limit_bytes=vmem_limit_bytes),
    )(x_stream, *flat_params)

    if discrete:
        return y
    return y, logsigma


def init_policy_net_params(key, ob_dim, ac_dim, hidden_size, n_layers,
                           discrete):
    """Deterministic parameter init matching the module's __init__ shapes.

    Weights: Xavier-uniform (as in weights_init_). Biases: PyTorch Linear
    default U(-1/sqrt(fan_in), 1/sqrt(fan_in)). logsigma: standard normal.
    """
    layer_dims = [ob_dim] + [hidden_size] * n_layers + [ac_dim]
    weights, biases = [], []
    for i in range(len(layer_dims) - 1):
        fan_in, fan_out = layer_dims[i], layer_dims[i + 1]
        key, wk, bk = jax.random.split(key, 3)
        limit = jnp.sqrt(6.0 / (fan_in + fan_out))  # xavier_uniform_
        # stored as (in, out) == PyTorch weight.T
        w = jax.random.uniform(wk, (fan_in, fan_out), jnp.float32,
                               -limit, limit)
        b_bound = 1.0 / jnp.sqrt(float(fan_in))
        b = jax.random.uniform(bk, (fan_out,), jnp.float32,
                               -b_bound, b_bound)
        weights.append(w)
        biases.append(b)

    logsigma = None
    if not discrete:
        key, sk = jax.random.split(key)
        logsigma = jax.random.normal(sk, (ac_dim,), jnp.float32)
    return weights, biases, logsigma


def policy_net_reference(x, weights, biases, logsigma, discrete):
    """Pure-JAX reference of the PyTorch forward."""
    h = x
    n = len(weights)
    for i, (w, b) in enumerate(zip(weights, biases)):
        h = h @ w + b
        if i < n - 1:
            h = jnp.tanh(h)
    if discrete:
        return h
    return h, logsigma


if __name__ == "__main__":
    # Small shapes consistent with the module's forward: ts_ob_no (batch, ob_dim).
    batch = 8
    ob_dim = 16
    ac_dim = 8
    hidden_size = 32
    n_layers = 2
    discrete = False  # exercise the (means, logsigma) branch

    key = jax.random.PRNGKey(0)
    key, xk = jax.random.split(key)
    x = jax.random.normal(xk, (batch, ob_dim), jnp.float32)

    weights, biases, logsigma = init_policy_net_params(
        key, ob_dim, ac_dim, hidden_size, n_layers, discrete)

    # --- Pallas kernel (small batch -> single tile, un-padded narrow output) ---
    means, logsig_out = policy_net_forward(
        x, weights, biases, logsigma, discrete=discrete)
    means = jax.block_until_ready(means)
    logsig_out = jax.block_until_ready(logsig_out)

    # --- Reference check ---
    ref_means, ref_logsig = policy_net_reference(
        x, weights, biases, logsigma, discrete)
    assert means.shape == (batch, ac_dim)
    assert logsig_out.shape == (ac_dim,)
    assert jnp.allclose(means, ref_means, atol=1e-5, rtol=1e-5)
    assert jnp.allclose(logsig_out, ref_logsig)

    # Discrete branch (logits only).
    logits = policy_net_forward(x, weights, biases, discrete=True)
    logits = jax.block_until_ready(logits)
    assert jnp.allclose(logits, ref_means, atol=1e-5, rtol=1e-5)

    # --- Larger, non-tile-divisible batch: exercises the batch grid, the
    # ragged last tile (no wrapper-side pad / slice), resident-weight
    # streaming, and the >=2-step megacore split. ---
    batch2 = 300
    key, xk2 = jax.random.split(key)
    x2 = jax.random.normal(xk2, (batch2, ob_dim), jnp.float32)
    logits2 = policy_net_forward(x2, weights, biases, discrete=True,
                                 block_batch=128)
    logits2 = jax.block_until_ready(logits2)
    ref2 = policy_net_reference(x2, weights, biases, None, True)
    assert logits2.shape == (batch2, ac_dim)
    assert jnp.allclose(logits2, ref2, atol=1e-5, rtol=1e-5)

    # Default (large) tile path on the same batch: tb capped to ceil(300/2).
    logits2b = policy_net_forward(x2, weights, biases, discrete=True)
    logits2b = jax.block_until_ready(logits2b)
    assert jnp.allclose(logits2b, ref2, atol=1e-5, rtol=1e-5)

    # --- Optional bf16 streaming path (v6e/v7x friendly); looser tolerance
    # since bf16 inputs change the numerics, by design. ---
    logits_bf16 = policy_net_forward(x2, weights, biases, discrete=True,
                                     block_batch=128, mxu_dtype=jnp.bfloat16)
    logits_bf16 = jax.block_until_ready(logits_bf16)
    assert jnp.allclose(logits_bf16, ref2, atol=5e-2, rtol=5e-2)

    print("KERNEL_OK")
</pallas_src>

<mosaic_0001>
module attributes {stable_mosaic.version = 11 : i64} {
  func.func @kernel(%arg0: i32, %arg1: memref<8x16xf32, #tpu.memory_space<vmem>>, %arg2: memref<16x32xf32, #tpu.memory_space<vmem>>, %arg3: memref<1x32xf32, #tpu.memory_space<vmem>>, %arg4: memref<32x32xf32, #tpu.memory_space<vmem>>, %arg5: memref<1x32xf32, #tpu.memory_space<vmem>>, %arg6: memref<32x8xf32, #tpu.memory_space<vmem>>, %arg7: memref<1x8xf32, #tpu.memory_space<vmem>>, %arg8: memref<8x8xf32, #tpu.memory_space<vmem>>) attributes {dimension_semantics = [#tpu.dimension_semantics<parallel>], iteration_bounds = array<i64: 1>, scalar_prefetch = 0 : i64, scratch_operands = 0 : i64, tpu.core_type = #tpu.core_type<tc>, window_params = [{transform_indices = @transform_0, window_bounds = array<i64: 8, 16>}, {pipeline_mode = #tpu.pipeline_mode<synchronous>, transform_indices = @transform_1, window_bounds = array<i64: 16, 32>}, {pipeline_mode = #tpu.pipeline_mode<synchronous>, transform_indices = @transform_2, window_bounds = array<i64: 1, 32>}, {pipeline_mode = #tpu.pipeline_mode<synchronous>, transform_indices = @transform_3, window_bounds = array<i64: 32, 32>}, {pipeline_mode = #tpu.pipeline_mode<synchronous>, transform_indices = @transform_4, window_bounds = array<i64: 1, 32>}, {pipeline_mode = #tpu.pipeline_mode<synchronous>, transform_indices = @transform_5, window_bounds = array<i64: 32, 8>}, {pipeline_mode = #tpu.pipeline_mode<synchronous>, transform_indices = @transform_6, window_bounds = array<i64: 1, 8>}, {transform_indices = @transform_7, window_bounds = array<i64: 8, 8>}]} {
    %c0 = arith.constant 0 : index
    %c0_0 = arith.constant 0 : index
    %0 = vector.load %arg1[%c0, %c0_0] : memref<8x16xf32, #tpu.memory_space<vmem>>, vector<8x16xf32>
    %c0_1 = arith.constant 0 : index
    %c0_2 = arith.constant 0 : index
    %1 = vector.load %arg2[%c0_1, %c0_2] : memref<16x32xf32, #tpu.memory_space<vmem>>, vector<16x32xf32>
    %c0_3 = arith.constant 0 : index
    %c0_4 = arith.constant 0 : index
    %2 = vector.load %arg3[%c0_3, %c0_4] : memref<1x32xf32, #tpu.memory_space<vmem>>, vector<1x32xf32>
    %cst = arith.constant dense<0.000000e+00> : vector<8x32xf32>
    %3 = tpu.matmul %0, %1, %cst {dimension_numbers = #tpu.dot_dimension_numbers<[1], [0], [0], [1], [0, 0, 1, 1], [], []>} : vector<8x16xf32>, vector<16x32xf32>, vector<8x32xf32> -> vector<8x32xf32>
    %4 = vector.broadcast %2 : vector<1x32xf32> to vector<8x32xf32>
    %5 = arith.addf %3, %4 : vector<8x32xf32>
    %6 = math.tanh %5 : vector<8x32xf32>
    %c0_5 = arith.constant 0 : index
    %c0_6 = arith.constant 0 : index
    %7 = vector.load %arg4[%c0_5, %c0_6] : memref<32x32xf32, #tpu.memory_space<vmem>>, vector<32x32xf32>
    %c0_7 = arith.constant 0 : index
    %c0_8 = arith.constant 0 : index
    %8 = vector.load %arg5[%c0_7, %c0_8] : memref<1x32xf32, #tpu.memory_space<vmem>>, vector<1x32xf32>
    %cst_9 = arith.constant dense<0.000000e+00> : vector<8x32xf32>
    %9 = tpu.matmul %6, %7, %cst_9 {dimension_numbers = #tpu.dot_dimension_numbers<[1], [0], [0], [1], [0, 0, 1, 1], [], []>} : vector<8x32xf32>, vector<32x32xf32>, vector<8x32xf32> -> vector<8x32xf32>
    %10 = vector.broadcast %8 : vector<1x32xf32> to vector<8x32xf32>
    %11 = arith.addf %9, %10 : vector<8x32xf32>
    %12 = math.tanh %11 : vector<8x32xf32>
    %c0_10 = arith.constant 0 : index
    %c0_11 = arith.constant 0 : index
    %13 = vector.load %arg6[%c0_10, %c0_11] : memref<32x8xf32, #tpu.memory_space<vmem>>, vector<32x8xf32>
    %c0_12 = arith.constant 0 : index
    %c0_13 = arith.constant 0 : index
    %14 = vector.load %arg7[%c0_12, %c0_13] : memref<1x8xf32, #tpu.memory_space<vmem>>, vector<1x8xf32>
    %cst_14 = arith.constant dense<0.000000e+00> : vector<8x8xf32>
    %15 = tpu.matmul %12, %13, %cst_14 {dimension_numbers = #tpu.dot_dimension_numbers<[1], [0], [0], [1], [0, 0, 1, 1], [], []>} : vector<8x32xf32>, vector<32x8xf32>, vector<8x8xf32> -> vector<8x8xf32>
    %16 = vector.broadcast %14 : vector<1x8xf32> to vector<8x8xf32>
    %17 = arith.addf %15, %16 : vector<8x8xf32>
    %c0_15 = arith.constant 0 : index
    %c0_16 = arith.constant 0 : index
    %18 = vector.load %arg8[%c0_15, %c0_16] : memref<8x8xf32, #tpu.memory_space<vmem>>, vector<8x8xf32>
    tpu.vector_store %arg8[%c0_15, %c0_16], %17 {strides = array<i32>} : memref<8x8xf32, #tpu.memory_space<vmem>>, vector<8x8xf32>,
    return
  }
  func.func @transform_0(%arg0: i32) -> (i32, i32) {
    %c0_i32 = arith.constant 0 : i32
    %c0_i32_0 = arith.constant 0 : i32
    return %arg0, %c0_i32 : i32, i32
  }
  func.func @transform_1(%arg0: i32) -> (i32, i32) {
    %c0_i32 = arith.constant 0 : i32
    %c0_i32_0 = arith.constant 0 : i32
    %c0_i32_1 = arith.constant 0 : i32
    return %c0_i32, %c0_i32_0 : i32, i32
  }
  func.func @transform_2(%arg0: i32) -> (i32, i32) {
    %c0_i32 = arith.constant 0 : i32
    %c0_i32_0 = arith.constant 0 : i32
    %c0_i32_1 = arith.constant 0 : i32
    return %c0_i32, %c0_i32_0 : i32, i32
  }
  func.func @transform_3(%arg0: i32) -> (i32, i32) {
    %c0_i32 = arith.constant 0 : i32
    %c0_i32_0 = arith.constant 0 : i32
    %c0_i32_1 = arith.constant 0 : i32
    return %c0_i32, %c0_i32_0 : i32, i32
  }
  func.func @transform_4(%arg0: i32) -> (i32, i32) {
    %c0_i32 = arith.constant 0 : i32
    %c0_i32_0 = arith.constant 0 : i32
    %c0_i32_1 = arith.constant 0 : i32
    return %c0_i32, %c0_i32_0 : i32, i32
  }
  func.func @transform_5(%arg0: i32) -> (i32, i32) {
    %c0_i32 = arith.constant 0 : i32
    %c0_i32_0 = arith.constant 0 : i32
    %c0_i32_1 = arith.constant 0 : i32
    return %c0_i32, %c0_i32_0 : i32, i32
  }
  func.func @transform_6(%arg0: i32) -> (i32, i32) {
    %c0_i32 = arith.constant 0 : i32
    %c0_i32_0 = arith.constant 0 : i32
    %c0_i32_1 = arith.constant 0 : i32
    return %c0_i32, %c0_i32_0 : i32, i32
  }
  func.func @transform_7(%arg0: i32) -> (i32, i32) {
    %c0_i32 = arith.constant 0 : i32
    %c0_i32_0 = arith.constant 0 : i32
    return %arg0, %c0_i32 : i32, i32
  }
}

</mosaic_0001>

<bundles_post_ra>
// kernel: tpu_custom_call.1
= control target key start
LH: loop header
LB: loop body
LE: loop exit
PB: predicated region body
PF: predicated region fallthrough
CT: control target
= control target key end

     0   :  { %12 = vsyncpa [#allocation3], 0  ;;  %s541_s0 = inlined_call_operand.hbm [shape: f32[8,16], index: 0, kind: input, shape index: {}]   ;;  %s542_s1 = inlined_call_operand.vmem [shape: f32[16,32], index: 1, kind: input, shape index: {}]   ;;  %s543_s2 = inlined_call_operand.vmem [shape: f32[1,32], index: 2, kind: input, shape index: {}]   ;;  %s544_s3 = inlined_call_operand.vmem [shape: f32[32,32], index: 3, kind: input, shape index: {}]   ;;  %s545_s4 = inlined_call_operand.vmem [shape: f32[1,32], index: 4, kind: input, shape index: {}]   ;;  %s546_s5 = inlined_call_operand.vmem [shape: f32[32,8], index: 5, kind: input, shape index: {}]   ;;  %s547_s6 = inlined_call_operand.vmem [shape: f32[1,8], index: 6, kind: input, shape index: {}]   ;;  %s548_s7 = inlined_call_operand.hbm [shape: f32[8,8], index: 7, kind: output, shape index: {}]  }
   0x1   :  { %13 = vsyncpa [#allocation4], 0  ;;  %s431_s24 = smov [#allocation2]   ;;  %s383_s28 = scalar_lea.hbm %s541_s0, 128 }
   0x2   :  { %s20_s25 = sshll.u32 %s431_s24, 4  ;;  %p384_p0 = scmp.ne.s32.totalorder %s541_s0, %s383_s28  ;;  %s21_s25 = int_to_ptr.vmem [resolvable:$true] %s20_s25 }
   0x3   :  { %p387_p1 = scmp.lt.u32.totalorder %s383_s28, %s541_s0 }
   0x5   :  { %p389_p2 = pnand %p387_p1, %p384_p0 }
   0x7   :  { %392 = shalt.err (!%p389_p2)
}
   0x8   :  { %s393_s10 = scalar_lea.vmem %s21_s25, 128  ;;  %p398_p4 = scmp.lt.s32.totalorder %s21_s25, %s21_s25 }
   0x9   :  { %p394_p3 = scmp.ne.s32.totalorder %s21_s25, %s393_s10  ;;  %p399_p5 = scmp.lt.s32.totalorder %s393_s10, %s393_s10 }
   0xb   :  { %p400_p6 = por %p399_p5, %p398_p4 }
   0xd   :  { %p401_p7 = pnand %p400_p6, %p394_p3 }
   0xf   :  { %404 = shalt.err (!%p401_p7)
}
  0x10   :  { %23 = dma.hbm_to_vmem [thread:$0]  %s541_s0, 128, %s21_s25, [#allocation3]  }
  0x11   :  { %427 = dma.done.wait [#allocation3], 128  }
  0x12   :  { %428 = vsyncadd [#allocation3], 4294967168  ;;  %v432_v0 = vmov 0.0|0.0   ;;  %vm433_vm0 = vmmov 0   ;;  %v434_v1 = vmov 0.0   ;;  %v40_v2 = vld [vmem:[%s542_s1] sm:$0xff] }
  0x13   :  { %359 = vmatprep.subr.bf16.mxu0 %v432_v0  ;;  %334 = vmatprep.mubr.msk.f32.mxu0 %vm433_vm0, %v434_v1  ;;  %v41_v3 = vld [vmem:[%s542_s1 + $0x8] sm:$0xff]  ;;  %v39_v5 = vld [vmem:[#allocation2] sm:$0xff]  ;;  %vm49_vm1 = vcmask 130048   ;;  %v126_v8 = vld [vmem:[%s544_s3 + $0x10] sm:$0xff]  ;;  %vm135_vm2 = vcmask 261120   ;;  %vm294_vm3 = vcmask 64512  }
  0x14   :  { %362 = vmatprep.subr.bf16.mxu1 %v432_v0  ;;  %345 = vmatprep.mubr.msk.f32.mxu1 %vm433_vm0, %v434_v1  ;;  %v360_v4 = vpack.c.bf16 %v41_v3, %v40_v2  ;;  %v124_v6 = vld [vmem:[%s544_s3] sm:$0xff]  ;;  %v125_v7 = vld [vmem:[%s544_s3 + $0x8] sm:$0xff]  ;;  %v127_v10 = vld [vmem:[%s544_s3 + $0x18] sm:$0xff] }
  0x15   :  { %v363_v9 = vpack.c.bf16 %v125_v7, %v124_v6  ;;  %v366_v11 = vpack.c.bf16 %v127_v10, %v126_v8  ;;  %v311_v12 = vld [vmem:[%s543_s2] ss:$0 sm:$0xff]  ;;  %v211_v18 = vld [vmem:[%s546_s5 + $0x8] sm:$0xff]  ;;  %v212_v19 = vld [vmem:[%s546_s5 + $0x10] sm:$0xff] }
  0x16   :  { %361 = vmatpush3.bf16.msra.mxu0 %v360_v4  ;;  %v210_v17 = vld [vmem:[%s546_s5] sm:$0xff]  ;;  %v213_v21 = vld [vmem:[%s546_s5 + $0x18] sm:$0xff]  ;;  %s435_s5 = smov [#allocation5]  }
  0x17   :  { %368 = vmatprep.subr.bf16.mxu0 %v432_v0  ;;  %364 = vmatpush3.bf16.msra.mxu1 %v363_v9  ;;  %v369_v20 = vpack.c.bf16 %v211_v18, %v210_v17  ;;  %v372_v22 = vpack.c.bf16 %v213_v21, %v212_v19  ;;  %v313_v23 = vld [vmem:[%s545_s4] ss:$0 sm:$0xff]  ;;  %s302_s12 = sshll.u32 %s435_s5, 4  ;;  %s303_s12 = int_to_ptr.vmem [resolvable:$true] %s302_s12 }
  0x18   :  { %365 = vmatprep.subr.bf16.mxu1 %v432_v0  ;;  %v315_v28 = vld [vmem:[%s547_s6] ss:$0 sm:$0xff]  ;;  %s405_s4 = scalar_lea.vmem %s303_s12, 128  ;;  %p410_p9 = scmp.lt.s32.totalorder %s303_s12, %s303_s12 }
  0x19   :  { %335 = vmatmul.mubr.msk.f32.vlgmr.msra.gmra.mrb[0].mxu0 %vm49_vm1, %v39_v5  ;;  %p406_p8 = scmp.ne.s32.totalorder %s303_s12, %s405_s4  ;;  %p411_p10 = scmp.lt.s32.totalorder %s405_s4, %s405_s4 }
  0x1a   :  { %356 = vmatprep.mubr.msk.f32.mxu0 %vm433_vm0, %v434_v1  ;;  %370 = vmatpush3.bf16.msra.mxu0 %v369_v20 }
  0x1b   :  { %367 = vmatpush3.bf16.msra.mxu1 %v366_v11  ;;  %371 = vmatprep.subr.bf16.mxu0 %v432_v0  ;;  %p412_p11 = por %p411_p10, %p410_p9 }
  0x1d   :  { %p413_p12 = pnand %p412_p11, %p406_p8 }
  0x1e   :  { %373 = vmatpush3.bf16.msra.mxu0 %v372_v22 }
  0xec   :  { %v119_v13 = vpop.f32.mrb[0].mxu0 }
  0xed   :  { %v120_v14 = vadd.f32 %v311_v12, %v119_v13  ;;  %v336_v15 = vpop.f32.mrb[1].mxu0 }
  0xef   :  { %379 = vtanh.f32 %v120_v14 }
  0xf9   :  { %v380_v16 = vpop.eup %379 }
  0xfa   :  { %346 = vmatmul.mubr.msk.f32.vlgmr.msra.gmra.mrb[0].mxu1 %vm135_vm2, %v380_v16 }
 0x1cd   :  { %v205_v24 = vpop.f32.mrb[0].mxu1 }
 0x1ce   :  { %v206_v25 = vadd.f32 %v313_v23, %v205_v24  ;;  %v347_v26 = vpop.f32.mrb[1].mxu1 }
 0x1d0   :  { %381 = vtanh.f32 %v206_v25 }
 0x1da   :  { %v382_v27 = vpop.eup %381 }
 0x1db   :  { %357 = vmatmul.mubr.msk.f32.vlgmr.msra.gmra.mrb[2].mxu0 %vm135_vm2, %v382_v27 }
 0x2ae   :  { %v290_v29 = vpop.f32.mrb[2].mxu0 }
 0x2af   :  { %v291_v30 = vadd.f32 %v315_v28, %v290_v29  ;;  %v358_v31 = vpop.f32.mrb[3].mxu0 }
 0x2b1   :  { %295 = vst.msk [vmem:[#allocation5] sm:$0xff] %vm294_vm3, %v291_v30 }
 0x2b2   :  { %416 = shalt.err (!%p413_p12)
}
 0x2b3   :  { %s417_s15 = scalar_lea.hbm %s548_s7, 128 }
 0x2b4   :  { %p418_p13 = scmp.ne.s32.totalorder %s548_s7, %s417_s15  ;;  %p421_p0 = scmp.lt.u32.totalorder %s417_s15, %s548_s7 }
 0x2b6   :  { %p423_p1 = pnand %p421_p0, %p418_p13 }
 0x2b8   :  { %426 = shalt.err (!%p423_p1)
}
 0x2b9   :  { %305 = dma.vmem_to_hbm [thread:$0]  %s303_s12, 128, %s548_s7, [#allocation4]  }
 0x2ba   :  { %429 = dma.done.wait [#allocation4], 128  }
 0x2bb   :  { %430 = vsyncadd [#allocation4], 4294967168 }
 0x2bc   :  { %309 = vsyncpa [#allocation3], 1 }
 0x2bd   :  { %310 = vsyncpa [#allocation4], 1 }

</bundles_post_ra>
